<compile_context>
chip_gen: v7x
topology: tpu7x:2x2x1
jax: 0.10.0
libtpu: 0.0.40
codegen_flags: <defaults>
</compile_context>

<pallas_src>
import jax
import jax.numpy as jnp
from jax.experimental import pallas as pl
from jax.experimental.pallas import tpu as pltpu

LANES = 128
GRAIN = 8 * LANES                 # kernel handles whole (8,128) sublane groups
_LOG2 = 0.6931471805599453


def _round_down(x, m):
    return (x // m) * m


def _target_tile_bytes():
    """HBM bytes per input tile per grid step (per input array)."""
    tile = 2 * 1024 * 1024                      # 2 MiB: good for v5e/v6e
    try:
        info = pltpu.get_tpu_info()
        vmem = getattr(info, "vmem_capacity_bytes", None)
        # v7x-class parts have 64 MiB VMEM but ~2.3x the HBM bandwidth of v6e:
        # use bigger steps there so fixed per-step overhead stays hidden.
        if vmem is not None and vmem <= 64 * 1024 * 1024:
            tile = 4 * 1024 * 1024
    except Exception:
        pass
    return tile


def _stable_logcosh_weighted(err_f32, factor):
    # log(cosh(x)) = |x| + log1p(exp(-2|x|)) - log(2)   (exact, overflow-free)
    a = jnp.abs(err_f32)
    logcosh = a + jnp.log1p(jnp.exp(-2.0 * a)) - _LOG2
    return logcosh * (1.0 + factor * a)


def _make_kernel(factor, row_block, needs_mask, rows_in_last):
    # All closure values are static Python scalars; row_block is a multiple of 8.
    def kernel(yp_ref, yt_ref, out_ref):
        # Cast in-kernel so HBM traffic stays at the input's native width.
        err = yt_ref[...].astype(jnp.float32) - yp_ref[...].astype(jnp.float32)
        weighted = _stable_logcosh_weighted(err, factor)

        def fold(w):
            # Fold rows into one (8, LANES) partial-sum tile: pure VPU adds; the
            # tiny cross-lane reduce happens once in the wrapper.
            return w.reshape(row_block // 8, 8, LANES).sum(axis=0)

        if not needs_mask:
            out_ref[...] = fold(weighted)
        else:
            i = pl.program_id(0)
            last = pl.num_programs(0) - 1

            @pl.when(i != last)
            def _():
                out_ref[...] = fold(weighted)

            @pl.when(i == last)
            def _():
                # Mask the final per-element value so padded rows add exactly 0.0.
                row = jax.lax.broadcasted_iota(jnp.int32, (row_block, LANES), 0)
                out_ref[...] = fold(jnp.where(row < rows_in_last, weighted, 0.0))

    return kernel


def logcosh_loss(y_pred, y_true, factor=1.5):
    assert y_pred.shape == y_true.shape
    factor = float(factor)
    n = y_pred.size

    yp = jnp.ravel(y_pred)
    yt = jnp.ravel(y_true)

    total = jnp.float32(0.0)

    n_bulk = _round_down(n, GRAIN)
    if n_bulk < n:
        # Sub-1024-element remainder in plain JAX (negligible work).
        err_tail = yt[n_bulk:].astype(jnp.float32) - yp[n_bulk:].astype(jnp.float32)
        total = total + jnp.sum(_stable_logcosh_weighted(err_tail, factor))

    if n_bulk > 0:
        rows = n_bulk // LANES                       # multiple of 8
        yp2 = (yp if n_bulk == n else yp[:n_bulk]).reshape(rows, LANES)
        yt2 = (yt if n_bulk == n else yt[:n_bulk]).reshape(rows, LANES)

        itemsize = max(jnp.dtype(y_pred.dtype).itemsize,
                       jnp.dtype(y_true.dtype).itemsize)
        tile_bytes = _target_tile_bytes()
        max_rows = max(512, _round_down(tile_bytes // (LANES * itemsize), 32))

        if rows <= max_rows:
            row_block = rows                         # full extent: always legal
        else:
            row_block = max_rows                     # multiple of 32: legal for any dtype
        num_blocks = (rows + row_block - 1) // row_block
        needs_mask = (rows % row_block) != 0
        rows_in_last = rows - (num_blocks - 1) * row_block

        partials = pl.pallas_call(
            _make_kernel(factor, row_block, needs_mask, rows_in_last),
            out_shape=jax.ShapeDtypeStruct((num_blocks * 8, LANES), jnp.float32),
            grid=(num_blocks,),
            in_specs=[
                pl.BlockSpec((row_block, LANES), lambda i: (i, 0)),
                pl.BlockSpec((row_block, LANES), lambda i: (i, 0)),
            ],
            out_specs=pl.BlockSpec((8, LANES), lambda i: (i, 0)),
            compiler_params=pltpu.CompilerParams(
                # Independent per-block outputs -> parallel row-block axis (shards
                # across both TensorCores on v7x; neutral on single-TC v5e/v6e).
                dimension_semantics=("parallel",),
                # Large double-buffered tiles (up to 2 in x 2 buf x 4 MiB = 16 MiB)
                # need more than v5e's 16 MiB scoped-VMEM default.
                vmem_limit_bytes=32 * 1024 * 1024,
            ),
        )(yp2, yt2)

        total = total + jnp.sum(partials)

    return (total / n).astype(jnp.float32)


def logcosh_loss_ref(y_pred, y_true, factor=1.5):
    err = y_true.astype(jnp.float32) - y_pred.astype(jnp.float32)
    logcosh = jnp.log(jnp.cosh(err))
    return jnp.mean(logcosh * (1.0 + factor * jnp.abs(err)))


if __name__ == "__main__":
    key = jax.random.PRNGKey(0)
    k1, k2 = jax.random.split(key)
    shape = (2, 4, 16, 16)  # NCHW-like prediction/target tensors
    y_pred = jax.random.normal(k1, shape, dtype=jnp.float32)
    y_true = jax.random.normal(k2, shape, dtype=jnp.float32)

    out = logcosh_loss(y_pred, y_true, factor=1.5)
    out = jax.block_until_ready(out)

    ref = logcosh_loss_ref(y_pred, y_true, factor=1.5)
    assert jnp.allclose(out, ref, rtol=1e-5, atol=1e-6), (out, ref)
    print("KERNEL_OK")
</pallas_src>

<mosaic_0001>
module attributes {stable_mosaic.version = 11 : i64} {
  func.func @kernel(%arg0: i32, %arg1: memref<16x128xf32, #tpu.memory_space<vmem>>, %arg2: memref<16x128xf32, #tpu.memory_space<vmem>>, %arg3: memref<8x128xf32, #tpu.memory_space<vmem>>) attributes {dimension_semantics = [#tpu.dimension_semantics<parallel>], iteration_bounds = array<i64: 1>, scalar_prefetch = 0 : i64, scratch_operands = 0 : i64, tpu.core_type = #tpu.core_type<tc>, window_params = [{transform_indices = @transform_0, window_bounds = array<i64: 16, 128>}, {transform_indices = @transform_1, window_bounds = array<i64: 16, 128>}, {transform_indices = @transform_2, window_bounds = array<i64: 8, 128>}]} {
    %c0 = arith.constant 0 : index
    %c0_0 = arith.constant 0 : index
    %0 = vector.load %arg2[%c0, %c0_0] : memref<16x128xf32, #tpu.memory_space<vmem>>, vector<16x128xf32>
    %c0_1 = arith.constant 0 : index
    %c0_2 = arith.constant 0 : index
    %1 = vector.load %arg1[%c0_1, %c0_2] : memref<16x128xf32, #tpu.memory_space<vmem>>, vector<16x128xf32>
    %2 = arith.subf %0, %1 : vector<16x128xf32>
    %3 = math.absf %2 : vector<16x128xf32>
    %cst = arith.constant -2.000000e+00 : f32
    %4 = vector.broadcast %cst : f32 to vector<16x128xf32>
    %5 = arith.mulf %4, %3 : vector<16x128xf32>
    %6 = math.exp %5 : vector<16x128xf32>
    %7 = math.log1p %6 : vector<16x128xf32>
    %8 = arith.addf %3, %7 : vector<16x128xf32>
    %cst_3 = arith.constant 0.693147182 : f32
    %9 = vector.broadcast %cst_3 : f32 to vector<16x128xf32>
    %10 = arith.subf %8, %9 : vector<16x128xf32>
    %cst_4 = arith.constant 1.500000e+00 : f32
    %11 = vector.broadcast %cst_4 : f32 to vector<16x128xf32>
    %12 = arith.mulf %11, %3 : vector<16x128xf32>
    %cst_5 = arith.constant 1.000000e+00 : f32
    %13 = vector.broadcast %cst_5 : f32 to vector<16x128xf32>
    %14 = arith.addf %13, %12 : vector<16x128xf32>
    %15 = arith.mulf %10, %14 : vector<16x128xf32>
    %16 = vector.shape_cast %15 : vector<16x128xf32> to vector<2x8x128xf32>
    %cst_6 = arith.constant dense<0.000000e+00> : vector<8x128xf32>
    %17 = vector.multi_reduction <add>, %16, %cst_6 [0] : vector<2x8x128xf32> to vector<8x128xf32>
    %c0_7 = arith.constant 0 : index
    %c0_8 = arith.constant 0 : index
    %18 = vector.load %arg3[%c0_7, %c0_8] : memref<8x128xf32, #tpu.memory_space<vmem>>, vector<8x128xf32>
    tpu.vector_store %arg3[%c0_7, %c0_8], %17 {strides = array<i32>} : memref<8x128xf32, #tpu.memory_space<vmem>>, vector<8x128xf32>,
    return
  }
  func.func @transform_0(%arg0: i32) -> (i32, i32) {
    %c0_i32 = arith.constant 0 : i32
    %c0_i32_0 = arith.constant 0 : i32
    return %arg0, %c0_i32 : i32, i32
  }
  func.func @transform_1(%arg0: i32) -> (i32, i32) {
    %c0_i32 = arith.constant 0 : i32
    %c0_i32_0 = arith.constant 0 : i32
    return %arg0, %c0_i32 : i32, i32
  }
  func.func @transform_2(%arg0: i32) -> (i32, i32) {
    %c0_i32 = arith.constant 0 : i32
    %c0_i32_0 = arith.constant 0 : i32
    return %arg0, %c0_i32 : i32, i32
  }
}

</mosaic_0001>

<bundles_post_ra>
// kernel: tpu_custom_call.1
= control target key start
LH: loop header
LB: loop body
LE: loop exit
PB: predicated region body
PF: predicated region fallthrough
CT: control target
= control target key end

     0   :  { %7 = vsyncpa [#allocation3], 0  ;;  %s243_s0 = inlined_call_operand.hbm [shape: f32[16,128], index: 0, kind: input, shape index: {}]   ;;  %s244_s1 = inlined_call_operand.hbm [shape: f32[16,128], index: 1, kind: input, shape index: {}]   ;;  %s245_s2 = inlined_call_operand.hbm [shape: f32[8,128], index: 2, kind: output, shape index: {}]  }
   0x1   :  { %8 = vsyncpa [#allocation6], 0 }
   0x2   :  { %9 = vsyncpa [#allocation4], 0  ;;  %s187_s9 = smov [#allocation2]   ;;  %s115_s13 = scalar_lea.hbm %s243_s0, 256 }
   0x3   :  { %s15_s10 = sshll.u32 %s187_s9, 4  ;;  %p116_p0 = scmp.ne.s32.totalorder %s243_s0, %s115_s13  ;;  %s16_s10 = int_to_ptr.vmem [resolvable:$true] %s15_s10 }
   0x4   :  { %p119_p1 = scmp.lt.u32.totalorder %s115_s13, %s243_s0 }
   0x6   :  { %p121_p2 = pnand %p119_p1, %p116_p0 }
   0x8   :  { %124 = shalt.err (!%p121_p2)
}
   0x9   :  { %s125_s18 = scalar_lea.vmem %s16_s10, 256  ;;  %p130_p4 = scmp.lt.s32.totalorder %s16_s10, %s16_s10 }
   0xa   :  { %p126_p3 = scmp.ne.s32.totalorder %s16_s10, %s125_s18  ;;  %p131_p5 = scmp.lt.s32.totalorder %s125_s18, %s125_s18 }
   0xc   :  { %p132_p6 = por %p131_p5, %p130_p4 }
   0xe   :  { %p133_p7 = pnand %p132_p6, %p126_p3 }
  0x10   :  { %136 = shalt.err (!%p133_p7)
}
  0x11   :  { %s188_s19 = smov 128   ;;  %s189_s20 = smov 8  }
  0x12   :  { %21 = dma.hbm_to_vmem [thread:$0]  %s243_s0, 256, %s16_s10, [#allocation3], %s188_s19, %s188_s19, %s189_s20  }
  0x13   :  { %s190_s23 = smov [#allocation5]   ;;  %s137_s27 = scalar_lea.hbm %s244_s1, 256 }
  0x14   :  { %s27_s24 = sshll.u32 %s190_s23, 4  ;;  %p138_p8 = scmp.ne.s32.totalorder %s244_s1, %s137_s27  ;;  %s28_s24 = int_to_ptr.vmem [resolvable:$true] %s27_s24 }
  0x15   :  { %p141_p9 = scmp.lt.u32.totalorder %s137_s27, %s244_s1 }
  0x17   :  { %p143_p10 = pnand %p141_p9, %p138_p8 }
  0x19   :  { %146 = shalt.err (!%p143_p10)
}
  0x1a   :  { %s147_s4 = scalar_lea.vmem %s28_s24, 256  ;;  %p152_p12 = scmp.lt.s32.totalorder %s28_s24, %s28_s24 }
  0x1b   :  { %p148_p11 = scmp.ne.s32.totalorder %s28_s24, %s147_s4  ;;  %p153_p13 = scmp.lt.s32.totalorder %s147_s4, %s147_s4 }
  0x1d   :  { %p154_p0 = por %p153_p13, %p152_p12 }
  0x1f   :  { %p155_p1 = pnand %p154_p0, %p148_p11 }
  0x21   :  { %158 = shalt.err (!%p155_p1)
}
  0x22   :  { %33 = dma.hbm_to_vmem [thread:$0]  %s244_s1, 256, %s28_s24, [#allocation6], %s188_s19, %s188_s19, %s189_s20  }
  0x23   :  { %181 = dma.done.wait [#allocation3], 256  }
  0x24   :  { %182 = vsyncadd [#allocation3], 4294967040 }
  0x25   :  { %183 = dma.done.wait [#allocation6], 256  }
  0x26   :  { %184 = vsyncadd [#allocation6], 4294967040  ;;  %v40_v0 = vld [vmem:[#allocation5] sm:$0xff]  ;;  %v41_v1 = vld [vmem:[#allocation5 + $0x8] sm:$0xff]  ;;  %s191_s1 = smov [#allocation7]  }
  0x27   :  { %v42_v2 = vld [vmem:[#allocation2] sm:$0xff]  ;;  %v43_v3 = vld [vmem:[#allocation2 + $0x8] sm:$0xff]  ;;  %s90_s6 = sshll.u32 %s191_s1, 4  ;;  %s91_s6 = int_to_ptr.vmem [resolvable:$true] %s90_s6 }
  0x28   :  { %v44_v4 = vsub.f32 %v40_v0, %v42_v2  ;;  %v45_v5 = vsub.f32 %v41_v1, %v43_v3  ;;  %s159_s7 = scalar_lea.vmem %s91_s6, 128  ;;  %p164_p3 = scmp.lt.s32.totalorder %s91_s6, %s91_s6 }
  0x29   :  { %p160_p2 = scmp.ne.s32.totalorder %s91_s6, %s159_s7  ;;  %p165_p4 = scmp.lt.s32.totalorder %s159_s7, %s159_s7 }
  0x2a   :  { %v46_v6 = vand.u32 2147483647, %v44_v4  ;;  %v47_v7 = vand.u32 2147483647, %v45_v5 }
  0x2b   :  { %p166_p5 = por %p165_p4, %p164_p3 }
  0x2c   :  { %v48_v8 = vmul.f32 -2.0, %v46_v6  ;;  %v49_v9 = vmul.f32 -2.0, %v47_v7  ;;  %v76_v25 = vmul.f32 1.5, %v46_v6  ;;  %v77_v28 = vmul.f32 1.5, %v47_v7 }
  0x2d   :  { %p167_p6 = pnand %p166_p5, %p160_p2 }
  0x2e   :  { %v50_v10 = vmul.f32 1.442695, %v48_v8  ;;  %v52_v11 = vmul.f32 1.442695, %v49_v9  ;;  %v78_v33 = vadd.f32 1.0, %v76_v25  ;;  %v79_v35 = vadd.f32 1.0, %v77_v28 }
  0x30   :  { %107 = vpow2.f32 %v50_v10 }
  0x31   :  { %109 = vpow2.f32 %v52_v11 }
  0x3a   :  { %v108_v12 = vpop.eup %107 }
  0x3b   :  { %v110_v13 = vpop.eup %109  ;;  %v54_v14 = vadd.f32 1.0, %v108_v12  ;;  %v57_v16 = vmul.f32 -0.5, %v108_v12  ;;  %v60_v19 = vand.u32 2147483647, %v108_v12 }
  0x3c   :  { %v63_v15 = vadd.f32 1.0, %v110_v13  ;;  %v66_v17 = vmul.f32 -0.5, %v110_v13  ;;  %v69_v21 = vand.u32 2147483647, %v110_v13 }
  0x3d   :  { %111 = vlog2.f32 %v54_v14  ;;  %v58_v18 = vadd.f32 1.0, %v57_v16  ;;  %vm61_vm0 = vcmp.lt.f32.partialorder %v60_v19, 0.0004427343 }
  0x3e   :  { %113 = vlog2.f32 %v63_v15  ;;  %v67_v20 = vadd.f32 1.0, %v66_v17  ;;  %vm70_vm1 = vcmp.lt.f32.partialorder %v69_v21, 0.0004427343 }
  0x3f   :  { %v59_v22 = vmul.f32 %v108_v12, %v58_v18 }
  0x40   :  { %v68_v24 = vmul.f32 %v110_v13, %v67_v20 }
  0x47   :  { %v112_v23 = vpop.eup %111 }
  0x48   :  { %v114_v26 = vpop.eup %113  ;;  %v56_v27 = vmul.f32 0.6931472, %v112_v23 }
  0x49   :  { %v65_v29 = vmul.f32 0.6931472, %v114_v26 }
  0x4a   :  { %v62_v30 = vsel %vm61_vm0, %v59_v22, %v56_v27 }
  0x4b   :  { %v71_v31 = vsel %vm70_vm1, %v68_v24, %v65_v29  ;;  %v72_v32 = vadd.f32 %v62_v30, %v46_v6 }
  0x4c   :  { %v73_v34 = vadd.f32 %v71_v31, %v47_v7 }
  0x4d   :  { %v100_v36 = vadd.f32 -0.6931472, %v72_v32 }
  0x4e   :  { %v101_v37 = vadd.f32 -0.6931472, %v73_v34 }
  0x4f   :  { %v80_v38 = vmul.f32 %v100_v36, %v78_v33 }
  0x50   :  { %v81_v39 = vmul.f32 %v101_v37, %v79_v35 }
  0x52   :  { %v82_v40 = vadd.f32 %v81_v39, %v80_v38 }
  0x54   :  { %83 = vst [vmem:[#allocation7] sm:$0xff] %v82_v40 }
  0x55   :  { %170 = shalt.err (!%p167_p6)
}
  0x56   :  { %s171_s10 = scalar_lea.hbm %s245_s2, 128 }
  0x57   :  { %p172_p7 = scmp.ne.s32.totalorder %s245_s2, %s171_s10  ;;  %p175_p8 = scmp.lt.u32.totalorder %s171_s10, %s245_s2 }
  0x59   :  { %p177_p9 = pnand %p175_p8, %p172_p7 }
  0x5b   :  { %180 = shalt.err (!%p177_p9)
}
  0x5c   :  { %93 = dma.vmem_to_hbm [thread:$0]  %s91_s6, 128, %s245_s2, [#allocation4]  }
  0x5d   :  { %185 = dma.done.wait [#allocation4], 128  }
  0x5e   :  { %186 = vsyncadd [#allocation4], 4294967168 }
  0x5f   :  { %97 = vsyncpa [#allocation3], 1 }
  0x60   :  { %98 = vsyncpa [#allocation6], 1 }
  0x61   :  { %99 = vsyncpa [#allocation4], 1 }

</bundles_post_ra>
